<compile_context>
chip_gen: v7x
topology: tpu7x:2x2x1
jax: 0.10.0
libtpu: 0.0.40
codegen_flags: <defaults>
</compile_context>

<pallas_src>
import functools

import jax
import jax.numpy as jnp
from jax.experimental import pallas as pl
from jax.experimental.pallas import tpu as pltpu


def _round_up(x, m):
    return (x + m - 1) // m * m


def _leaky_relu(x, slope=0.2):
    # max(x, slope*x) == LeakyReLU(slope) for 0 < slope < 1.
    return jnp.maximum(x, slope * x)


def _tpu_vmem_info():
    """Returns (scoped VMEM cap we allow ourselves, physical VMEM, chip has 2 TensorCores)."""
    phys = 128 << 20
    try:
        phys = int(pltpu.get_tpu_info().vmem_capacity_bytes)
    except Exception:
        pass
    # Leave headroom for Mosaic-internal scratch and mandatory pipeline buffers.
    cap = max(int(phys * 0.75), phys - (12 << 20))
    two_cores = phys <= (64 << 20)  # v7x: 64 MiB per TC, 2 TCs/chip; v5e/v6e: 128 MiB, 1 TC.
    return cap, phys, two_cores


# ----------------------------------------------------------------------------------------------
# Kernels
# ----------------------------------------------------------------------------------------------
def _encoder_fused_kernel(x_ref, w1_ref, w2_ref, w3_ref, b_ref, o_ref, *, e_pad, out_pad):
    """All three layers fused; all weights resident in VMEM."""
    cd = w1_ref.dtype
    b1 = b_ref[:, :e_pad]
    b2 = b_ref[:, e_pad:2 * e_pad]
    b3 = b_ref[:, 2 * e_pad:2 * e_pad + out_pad]

    x = x_ref[...].astype(cd)  # in-kernel cast: no extra HBM pass over activations
    h = jnp.dot(x, w1_ref[...], preferred_element_type=jnp.float32)
    h = _leaky_relu(h + b1).astype(cd)            # Dropout(p=0) == identity
    h = jnp.dot(h, w2_ref[...], preferred_element_type=jnp.float32)
    h = _leaky_relu(h + b2).astype(cd)            # Dropout(p=0) == identity
    out = jnp.dot(h, w3_ref[...], preferred_element_type=jnp.float32) + b3
    o_ref[...] = out.astype(o_ref.dtype)


def _encoder_tiled_kernel(x_ref, w1_ref, w2_ref, w3_ref, b_ref, o_ref,
                          h1_ref, acc_ref, *, e_pad, e_blk, out_pad):
    """Fallback: E dimension tiled (N of layer 2 / K of layer 3) with an f32 accumulator."""
    cd = w1_ref.dtype
    j = pl.program_id(1)

    @pl.when(j == 0)
    def _():
        b1 = b_ref[:, :e_pad]
        x = x_ref[...].astype(cd)
        h1 = jnp.dot(x, w1_ref[...], preferred_element_type=jnp.float32)
        h1_ref[...] = _leaky_relu(h1 + b1).astype(cd)
        acc_ref[...] = jnp.zeros_like(acc_ref)

    off = pl.multiple_of(e_pad + j * e_blk, 128)
    b2_j = b_ref[:, pl.ds(off, e_blk)]
    h2 = jnp.dot(h1_ref[...], w2_ref[...], preferred_element_type=jnp.float32)
    h2 = _leaky_relu(h2 + b2_j).astype(cd)
    acc_ref[...] += jnp.dot(h2, w3_ref[...], preferred_element_type=jnp.float32)

    @pl.when(j == pl.num_programs(1) - 1)
    def _():
        b3 = b_ref[:, 2 * e_pad:2 * e_pad + out_pad]
        o_ref[...] = (acc_ref[...] + b3).astype(o_ref.dtype)


# ----------------------------------------------------------------------------------------------
# Wrappers
# ----------------------------------------------------------------------------------------------
def encoder_prepare_params(w1, b1, w2, b2, w3, b3, *, compute_dtype=jnp.bfloat16):
    """Pad/cast the parameters ONCE (hoisted out of the per-forward path).

    wi are pre-transposed (in_features, out_features); bi are (out_features,) or (1, out_features).
    E and output dims are zero-padded to multiples of 128 (lane-dense tiles / unmasked stores);
    the layer-1 input dim is left unpadded.  Biases are concatenated into one f32 row [b1|b2|b3].
    """
    D_in, E = w1.shape
    D_out = w3.shape[1]
    Ep = _round_up(E, 128)
    Dp_out = _round_up(D_out, 128)
    cd = compute_dtype
    w1p = jnp.zeros((D_in, Ep), cd).at[:, :E].set(w1.astype(cd))
    w2p = jnp.zeros((Ep, Ep), cd).at[:E, :E].set(w2.astype(cd))
    w3p = jnp.zeros((Ep, Dp_out), cd).at[:E, :D_out].set(w3.astype(cd))
    bcat = jnp.zeros((1, 2 * Ep + Dp_out), jnp.float32)
    bcat = bcat.at[:, :E].set(b1.astype(jnp.float32).reshape(1, E))
    bcat = bcat.at[:, Ep:Ep + E].set(b2.astype(jnp.float32).reshape(1, E))
    bcat = bcat.at[:, 2 * Ep:2 * Ep + D_out].set(b3.astype(jnp.float32).reshape(1, D_out))
    return (w1p, w2p, w3p, bcat), D_out


@functools.partial(
    jax.jit,
    static_argnames=("out_features", "block_b", "block_e", "weight_buffers", "force_tiled"))
def encoder_forward(x, w1p, w2p, w3p, bcat, *, out_features, block_b=512, block_e=None,
                    weight_buffers=1, force_tiled=False):
    """x: (B, input_size); padded params from encoder_prepare_params."""
    B, D_in = x.shape
    assert w1p.shape[0] == D_in
    Ep = w1p.shape[1]
    Dp_out = w3p.shape[1]
    cd = w1p.dtype
    out_dtype = x.dtype

    vmem_cap, _, two_cores = _tpu_vmem_info()

    w_bytes = jnp.dtype(cd).itemsize
    x_bytes = jnp.dtype(x.dtype).itemsize
    o_bytes = jnp.dtype(out_dtype).itemsize
    wbuf = weight_buffers
    resident_weight_bytes = wbuf * ((D_in * Ep + Ep * Ep + Ep * Dp_out) * w_bytes
                                    + (2 * Ep + Dp_out) * 4)

    def fused_need(bb):
        tiles = 2 * bb * D_in * x_bytes + 2 * bb * Dp_out * o_bytes
        # in-kernel intermediates: casted x, two (bb,Ep) activations in f32 + compute dtype,
        # f32 output row before the final cast.
        scratch = bb * D_in * w_bytes + 2 * bb * Ep * (4 + w_bytes) + bb * Dp_out * 4
        return int((tiles + resident_weight_bytes + scratch) * 1.2) + (1 << 20)

    def tiled_need(bb, te):
        tiles = 2 * bb * D_in * x_bytes + 2 * bb * Dp_out * o_bytes
        w_res = wbuf * (D_in * Ep * w_bytes + (2 * Ep + Dp_out) * 4)
        w_stream = 2 * (Ep * te + te * Dp_out) * w_bytes       # W2 / W3 blocks, double-buffered
        scratch = (bb * Ep * w_bytes + bb * Dp_out * 4          # h1 scratch + f32 accumulator
                   + bb * D_in * w_bytes + bb * Ep * 4          # casted x, f32 h1
                   + bb * te * (4 + w_bytes) + bb * Dp_out * 4)  # f32/cd h2, partial product
        return int((tiles + w_res + w_stream + scratch) * 1.2) + (1 << 20)

    # ---- batch tile: biggest that fits VMEM; ">=2 grid steps" cap only on 2-TC chips --------
    row_align = 16
    want = _round_up(max((B + 1) // 2, 1), row_align) if two_cores else _round_up(B, row_align)
    bb = max(min(_round_up(block_b, row_align), want), row_align)
    while bb > row_align and fused_need(bb) > vmem_cap:
        bb = max(_round_up(bb // 2, row_align), row_align)

    use_tiled = force_tiled or fused_need(bb) > vmem_cap

    # ---- E tile for the fallback path --------------------------------------------------------
    te = Ep
    if use_tiled:
        cands = [t for t in range(Ep, 0, -128) if Ep % t == 0] or [Ep]
        if block_e is not None:
            te = block_e
        else:
            te = cands[-1]
            for t in cands:
                if tiled_need(bb, t) <= vmem_cap:
                    te = t
                    break
        while bb > row_align and tiled_need(bb, te) > vmem_cap:
            bb = max(_round_up(bb // 2, row_align), row_align)
        assert Ep % te == 0 and te % 128 == 0

    Bp = _round_up(B, bb)
    if Bp != B:
        # One padding pass; cast to the compute dtype while we're at it.
        xk = jnp.zeros((Bp, D_in), cd).at[:B].set(x.astype(cd))
    else:
        xk = x  # cast happens inside the kernel

    need = tiled_need(bb, te) if use_tiled else fused_need(bb)
    vmem_limit = int(min(vmem_cap, max(need, 16 << 20)))

    # Grid-invariant operands: single-buffer when supported (weight_buffers == 1).
    pm = pl.Buffered(1) if weight_buffers == 1 else None

    def wspec(shape, index_map):
        if pm is None:
            return pl.BlockSpec(shape, index_map)
        return pl.BlockSpec(shape, index_map, pipeline_mode=pm)

    if not use_tiled:
        out_padded = pl.pallas_call(
            functools.partial(_encoder_fused_kernel, e_pad=Ep, out_pad=Dp_out),
            out_shape=jax.ShapeDtypeStruct((Bp, Dp_out), out_dtype),
            grid_spec=pltpu.PrefetchScalarGridSpec(
                num_scalar_prefetch=0,
                grid=(Bp // bb,),
                in_specs=[
                    pl.BlockSpec((bb, D_in), lambda i: (i, 0)),            # x tile over batch
                    wspec((D_in, Ep), lambda i: (0, 0)),                   # W1 (resident)
                    wspec((Ep, Ep), lambda i: (0, 0)),                     # W2 (resident)
                    wspec((Ep, Dp_out), lambda i: (0, 0)),                 # W3 (resident)
                    wspec((1, 2 * Ep + Dp_out), lambda i: (0, 0)),         # [b1|b2|b3] (resident)
                ],
                out_specs=pl.BlockSpec((bb, Dp_out), lambda i: (i, 0)),    # lane-dense output
            ),
            compiler_params=pltpu.CompilerParams(
                dimension_semantics=("parallel",),
                vmem_limit_bytes=vmem_limit,
            ),
        )(xk, w1p, w2p, w3p, bcat)
    else:
        out_padded = pl.pallas_call(
            functools.partial(_encoder_tiled_kernel, e_pad=Ep, e_blk=te, out_pad=Dp_out),
            out_shape=jax.ShapeDtypeStruct((Bp, Dp_out), out_dtype),
            grid_spec=pltpu.PrefetchScalarGridSpec(
                num_scalar_prefetch=0,
                grid=(Bp // bb, Ep // te),
                in_specs=[
                    pl.BlockSpec((bb, D_in), lambda i, j: (i, 0)),         # x (resident across j)
                    wspec((D_in, Ep), lambda i, j: (0, 0)),                # W1 (resident)
                    pl.BlockSpec((Ep, te), lambda i, j: (0, j)),           # W2 column block
                    pl.BlockSpec((te, Dp_out), lambda i, j: (j, 0)),       # W3 row block
                    wspec((1, 2 * Ep + Dp_out), lambda i, j: (0, 0)),      # biases (resident)
                ],
                out_specs=pl.BlockSpec((bb, Dp_out), lambda i, j: (i, 0)),
                scratch_shapes=[
                    pltpu.VMEM((bb, Ep), cd),                # resident h1 activations
                    pltpu.VMEM((bb, Dp_out), jnp.float32),   # f32 accumulator
                ],
            ),
            compiler_params=pltpu.CompilerParams(
                dimension_semantics=("parallel", "arbitrary"),
                vmem_limit_bytes=vmem_limit,
            ),
        )(xk, w1p, w2p, w3p, bcat)

    return out_padded[:B, :out_features]


# ----------------------------------------------------------------------------------------------
# Reference + helpers
# ----------------------------------------------------------------------------------------------
def init_linear_params(key, in_features, out_features, dtype=jnp.float32):
    """PyTorch-default-style uniform(-1/sqrt(in), 1/sqrt(in)); returns W^T (in, out), b (1, out)."""
    k_w, k_b = jax.random.split(key)
    bound = 1.0 / jnp.sqrt(jnp.array(in_features, dtype=jnp.float32))
    w_t = jax.random.uniform(k_w, (in_features, out_features), dtype, -bound, bound)
    b = jax.random.uniform(k_b, (1, out_features), dtype, -bound, bound)
    return w_t, b


def encoder_reference(x, w1, b1, w2, b2, w3, b3, compute_dtype=jnp.float32):
    """Pure-JAX reference with the same low-precision matmul inputs / f32 accumulation."""
    cd = compute_dtype
    b1 = jnp.asarray(b1, jnp.float32).reshape(1, -1)
    b2 = jnp.asarray(b2, jnp.float32).reshape(1, -1)
    b3 = jnp.asarray(b3, jnp.float32).reshape(1, -1)
    h = _leaky_relu(jnp.dot(x.astype(cd), w1.astype(cd), preferred_element_type=jnp.float32) + b1)
    h = _leaky_relu(jnp.dot(h.astype(cd), w2.astype(cd), preferred_element_type=jnp.float32) + b2)
    return jnp.dot(h.astype(cd), w3.astype(cd), preferred_element_type=jnp.float32) + b3


if __name__ == "__main__":
    key = jax.random.PRNGKey(0)
    kx, k1, k2, k3, kx2 = jax.random.split(key, 5)

    # Small shapes consistent with the module: state vector -> encoding -> output.
    batch, input_size, encoding_size, output_size = 64, 32, 64, 16
    x = jax.random.normal(kx, (batch, input_size), jnp.float32)
    w1, b1 = init_linear_params(k1, input_size, encoding_size)
    w2, b2 = init_linear_params(k2, encoding_size, encoding_size)
    w3, b3 = init_linear_params(k3, encoding_size, output_size)

    params_f32, _ = encoder_prepare_params(w1, b1, w2, b2, w3, b3, compute_dtype=jnp.float32)
    params_bf16, _ = encoder_prepare_params(w1, b1, w2, b2, w3, b3, compute_dtype=jnp.bfloat16)

    # Probe single-buffered resident weights (pl.Buffered(1)); fall back to default
    # double-buffering if this JAX build rejects buffer_count=1.
    wb = 1
    try:
        jax.block_until_ready(
            encoder_forward(x, *params_bf16, out_features=output_size, weight_buffers=1))
    except Exception:
        wb = 2

    # 1) Exact-semantics check: f32 compute path vs f32 reference (tight tolerance).
    out_f32 = jax.block_until_ready(
        encoder_forward(x, *params_f32, out_features=output_size, weight_buffers=wb))
    ref_f32 = encoder_reference(x, w1, b1, w2, b2, w3, b3, jnp.float32)
    assert out_f32.shape == (batch, output_size)
    assert jnp.allclose(out_f32, ref_f32, atol=1e-5, rtol=1e-5), "f32 fused-path mismatch"

    # 2) Fast path: bf16 matmul inputs with f32 accumulation vs the same math in plain JAX.
    out_bf16 = jax.block_until_ready(
        encoder_forward(x, *params_bf16, out_features=output_size, weight_buffers=wb))
    ref_bf16 = encoder_reference(x, w1, b1, w2, b2, w3, b3, jnp.bfloat16)
    assert out_bf16.shape == (batch, output_size)
    assert jnp.allclose(out_bf16, ref_bf16, atol=5e-3, rtol=5e-3), "bf16 fused-path mismatch"

    # 3) Exercise the E-tiled fallback (used when resident weights exceed VMEM, e.g. v7x)
    #    plus the non-divisible-batch padding path.
    enc2, batch2 = 256, 50
    ka, kb, kc, kd = jax.random.split(kx2, 4)
    x2 = jax.random.normal(ka, (batch2, input_size), jnp.float32)
    w1b, b1b = init_linear_params(kb, input_size, enc2)
    w2b, b2b = init_linear_params(kc, enc2, enc2)
    w3b, b3b = init_linear_params(kd, enc2, output_size)
    params2, _ = encoder_prepare_params(w1b, b1b, w2b, b2b, w3b, b3b, compute_dtype=jnp.bfloat16)
    out_tiled = jax.block_until_ready(
        encoder_forward(x2, *params2, out_features=output_size, weight_buffers=wb,
                        force_tiled=True, block_e=128))
    ref_tiled = encoder_reference(x2, w1b, b1b, w2b, b2b, w3b, b3b, jnp.bfloat16)
    assert out_tiled.shape == (batch2, output_size)
    assert jnp.allclose(out_tiled, ref_tiled, atol=5e-3, rtol=5e-3), "tiled-path mismatch"

    print("KERNEL_OK")
</pallas_src>

<mosaic_0001>
module attributes {stable_mosaic.version = 11 : i64} {
  func.func @_encoder_fused_kernel(%arg0: i32, %arg1: memref<64x32xf32, #tpu.memory_space<vmem>>, %arg2: memref<32x128xbf16, #tpu.memory_space<vmem>>, %arg3: memref<128x128xbf16, #tpu.memory_space<vmem>>, %arg4: memref<128x128xbf16, #tpu.memory_space<vmem>>, %arg5: memref<1x384xf32, #tpu.memory_space<vmem>>, %arg6: memref<64x128xf32, #tpu.memory_space<vmem>>) attributes {dimension_semantics = [#tpu.dimension_semantics<parallel>], iteration_bounds = array<i64: 1>, scalar_prefetch = 0 : i64, scratch_operands = 0 : i64, tpu.core_type = #tpu.core_type<tc>, window_params = [{transform_indices = @transform_0, window_bounds = array<i64: 64, 32>}, {pipeline_mode = #tpu.pipeline_mode<synchronous>, transform_indices = @transform_1, window_bounds = array<i64: 32, 128>}, {pipeline_mode = #tpu.pipeline_mode<synchronous>, transform_indices = @transform_2, window_bounds = array<i64: 128, 128>}, {pipeline_mode = #tpu.pipeline_mode<synchronous>, transform_indices = @transform_3, window_bounds = array<i64: 128, 128>}, {pipeline_mode = #tpu.pipeline_mode<synchronous>, transform_indices = @transform_4, window_bounds = array<i64: 1, 384>}, {transform_indices = @transform_5, window_bounds = array<i64: 64, 128>}]} {
    %c0 = arith.constant 0 : index
    %c0_0 = arith.constant 0 : index
    %0 = vector.load %arg5[%c0, %c0_0] : memref<1x384xf32, #tpu.memory_space<vmem>>, vector<1x128xf32>
    %c0_1 = arith.constant 0 : index
    %c128 = arith.constant 128 : index
    %1 = vector.load %arg5[%c0_1, %c128] : memref<1x384xf32, #tpu.memory_space<vmem>>, vector<1x128xf32>
    %c0_2 = arith.constant 0 : index
    %c256 = arith.constant 256 : index
    %2 = vector.load %arg5[%c0_2, %c256] : memref<1x384xf32, #tpu.memory_space<vmem>>, vector<1x128xf32>
    %c0_3 = arith.constant 0 : index
    %c0_4 = arith.constant 0 : index
    %3 = vector.load %arg1[%c0_3, %c0_4] : memref<64x32xf32, #tpu.memory_space<vmem>>, vector<64x32xf32>
    %4 = arith.truncf %3 : vector<64x32xf32> to vector<64x32xbf16>
    %c0_5 = arith.constant 0 : index
    %c0_6 = arith.constant 0 : index
    %5 = vector.load %arg2[%c0_5, %c0_6] : memref<32x128xbf16, #tpu.memory_space<vmem>>, vector<32x128xbf16>
    %cst = arith.constant dense<0.000000e+00> : vector<64x128xf32>
    %6 = tpu.matmul %4, %5, %cst {dimension_numbers = #tpu.dot_dimension_numbers<[1], [0], [0], [1], [0, 0, 1, 1], [], []>} : vector<64x32xbf16>, vector<32x128xbf16>, vector<64x128xf32> -> vector<64x128xf32>
    %7 = vector.broadcast %0 : vector<1x128xf32> to vector<64x128xf32>
    %8 = arith.addf %6, %7 : vector<64x128xf32>
    %cst_7 = arith.constant 2.000000e-01 : f32
    %9 = vector.broadcast %cst_7 : f32 to vector<64x128xf32>
    %10 = arith.mulf %9, %8 : vector<64x128xf32>
    %11 = arith.maximumf %8, %10 : vector<64x128xf32>
    %12 = arith.truncf %11 : vector<64x128xf32> to vector<64x128xbf16>
    %c0_8 = arith.constant 0 : index
    %c0_9 = arith.constant 0 : index
    %13 = vector.load %arg3[%c0_8, %c0_9] : memref<128x128xbf16, #tpu.memory_space<vmem>>, vector<128x128xbf16>
    %cst_10 = arith.constant dense<0.000000e+00> : vector<64x128xf32>
    %14 = tpu.matmul %12, %13, %cst_10 {dimension_numbers = #tpu.dot_dimension_numbers<[1], [0], [0], [1], [0, 0, 1, 1], [], []>} : vector<64x128xbf16>, vector<128x128xbf16>, vector<64x128xf32> -> vector<64x128xf32>
    %15 = vector.broadcast %1 : vector<1x128xf32> to vector<64x128xf32>
    %16 = arith.addf %14, %15 : vector<64x128xf32>
    %cst_11 = arith.constant 2.000000e-01 : f32
    %17 = vector.broadcast %cst_11 : f32 to vector<64x128xf32>
    %18 = arith.mulf %17, %16 : vector<64x128xf32>
    %19 = arith.maximumf %16, %18 : vector<64x128xf32>
    %20 = arith.truncf %19 : vector<64x128xf32> to vector<64x128xbf16>
    %c0_12 = arith.constant 0 : index
    %c0_13 = arith.constant 0 : index
    %21 = vector.load %arg4[%c0_12, %c0_13] : memref<128x128xbf16, #tpu.memory_space<vmem>>, vector<128x128xbf16>
    %cst_14 = arith.constant dense<0.000000e+00> : vector<64x128xf32>
    %22 = tpu.matmul %20, %21, %cst_14 {dimension_numbers = #tpu.dot_dimension_numbers<[1], [0], [0], [1], [0, 0, 1, 1], [], []>} : vector<64x128xbf16>, vector<128x128xbf16>, vector<64x128xf32> -> vector<64x128xf32>
    %23 = vector.broadcast %2 : vector<1x128xf32> to vector<64x128xf32>
    %24 = arith.addf %22, %23 : vector<64x128xf32>
    %c0_15 = arith.constant 0 : index
    %c0_16 = arith.constant 0 : index
    %25 = vector.load %arg6[%c0_15, %c0_16] : memref<64x128xf32, #tpu.memory_space<vmem>>, vector<64x128xf32>
    tpu.vector_store %arg6[%c0_15, %c0_16], %24 {strides = array<i32>} : memref<64x128xf32, #tpu.memory_space<vmem>>, vector<64x128xf32>,
    return
  }
  func.func @transform_0(%arg0: i32) -> (i32, i32) {
    %c0_i32 = arith.constant 0 : i32
    %c0_i32_0 = arith.constant 0 : i32
    return %arg0, %c0_i32 : i32, i32
  }
  func.func @transform_1(%arg0: i32) -> (i32, i32) {
    %c0_i32 = arith.constant 0 : i32
    %c0_i32_0 = arith.constant 0 : i32
    %c0_i32_1 = arith.constant 0 : i32
    return %c0_i32, %c0_i32_0 : i32, i32
  }
  func.func @transform_2(%arg0: i32) -> (i32, i32) {
    %c0_i32 = arith.constant 0 : i32
    %c0_i32_0 = arith.constant 0 : i32
    %c0_i32_1 = arith.constant 0 : i32
    return %c0_i32, %c0_i32_0 : i32, i32
  }
  func.func @transform_3(%arg0: i32) -> (i32, i32) {
    %c0_i32 = arith.constant 0 : i32
    %c0_i32_0 = arith.constant 0 : i32
    %c0_i32_1 = arith.constant 0 : i32
    return %c0_i32, %c0_i32_0 : i32, i32
  }
  func.func @transform_4(%arg0: i32) -> (i32, i32) {
    %c0_i32 = arith.constant 0 : i32
    %c0_i32_0 = arith.constant 0 : i32
    %c0_i32_1 = arith.constant 0 : i32
    return %c0_i32, %c0_i32_0 : i32, i32
  }
  func.func @transform_5(%arg0: i32) -> (i32, i32) {
    %c0_i32 = arith.constant 0 : i32
    %c0_i32_0 = arith.constant 0 : i32
    return %arg0, %c0_i32 : i32, i32
  }
}

module attributes {stable_mosaic.version = 11 : i64} {
  func.func @_encoder_fused_kernel(%arg0: i32, %arg1: memref<64x32xf32, #tpu.memory_space<vmem>>, %arg2: memref<32x128xf32, #tpu.memory_space<vmem>>, %arg3: memref<128x128xf32, #tpu.memory_space<vmem>>, %arg4: memref<128x128xf32, #tpu.memory_space<vmem>>, %arg5: memref<1x384xf32, #tpu.memory_space<vmem>>, %arg6: memref<64x128xf32, #tpu.memory_space<vmem>>) attributes {dimension_semantics = [#tpu.dimension_semantics<parallel>], iteration_bounds = array<i64: 1>, scalar_prefetch = 0 : i64, scratch_operands = 0 : i64, tpu.core_type = #tpu.core_type<tc>, window_params = [{transform_indices = @transform_0, window_bounds = array<i64: 64, 32>}, {pipeline_mode = #tpu.pipeline_mode<synchronous>, transform_indices = @transform_1, window_bounds = array<i64: 32, 128>}, {pipeline_mode = #tpu.pipeline_mode<synchronous>, transform_indices = @transform_2, window_bounds = array<i64: 128, 128>}, {pipeline_mode = #tpu.pipeline_mode<synchronous>, transform_indices = @transform_3, window_bounds = array<i64: 128, 128>}, {pipeline_mode = #tpu.pipeline_mode<synchronous>, transform_indices = @transform_4, window_bounds = array<i64: 1, 384>}, {transform_indices = @transform_5, window_bounds = array<i64: 64, 128>}]} {
    %c0 = arith.constant 0 : index
    %c0_0 = arith.constant 0 : index
    %0 = vector.load %arg5[%c0, %c0_0] : memref<1x384xf32, #tpu.memory_space<vmem>>, vector<1x128xf32>
    %c0_1 = arith.constant 0 : index
    %c128 = arith.constant 128 : index
    %1 = vector.load %arg5[%c0_1, %c128] : memref<1x384xf32, #tpu.memory_space<vmem>>, vector<1x128xf32>
    %c0_2 = arith.constant 0 : index
    %c256 = arith.constant 256 : index
    %2 = vector.load %arg5[%c0_2, %c256] : memref<1x384xf32, #tpu.memory_space<vmem>>, vector<1x128xf32>
    %c0_3 = arith.constant 0 : index
    %c0_4 = arith.constant 0 : index
    %3 = vector.load %arg1[%c0_3, %c0_4] : memref<64x32xf32, #tpu.memory_space<vmem>>, vector<64x32xf32>
    %c0_5 = arith.constant 0 : index
    %c0_6 = arith.constant 0 : index
    %4 = vector.load %arg2[%c0_5, %c0_6] : memref<32x128xf32, #tpu.memory_space<vmem>>, vector<32x128xf32>
    %cst = arith.constant dense<0.000000e+00> : vector<64x128xf32>
    %5 = tpu.matmul %3, %4, %cst {dimension_numbers = #tpu.dot_dimension_numbers<[1], [0], [0], [1], [0, 0, 1, 1], [], []>} : vector<64x32xf32>, vector<32x128xf32>, vector<64x128xf32> -> vector<64x128xf32>
    %6 = vector.broadcast %0 : vector<1x128xf32> to vector<64x128xf32>
    %7 = arith.addf %5, %6 : vector<64x128xf32>
    %cst_7 = arith.constant 2.000000e-01 : f32
    %8 = vector.broadcast %cst_7 : f32 to vector<64x128xf32>
    %9 = arith.mulf %8, %7 : vector<64x128xf32>
    %10 = arith.maximumf %7, %9 : vector<64x128xf32>
    %c0_8 = arith.constant 0 : index
    %c0_9 = arith.constant 0 : index
    %11 = vector.load %arg3[%c0_8, %c0_9] : memref<128x128xf32, #tpu.memory_space<vmem>>, vector<128x128xf32>
    %cst_10 = arith.constant dense<0.000000e+00> : vector<64x128xf32>
    %12 = tpu.matmul %10, %11, %cst_10 {dimension_numbers = #tpu.dot_dimension_numbers<[1], [0], [0], [1], [0, 0, 1, 1], [], []>} : vector<64x128xf32>, vector<128x128xf32>, vector<64x128xf32> -> vector<64x128xf32>
    %13 = vector.broadcast %1 : vector<1x128xf32> to vector<64x128xf32>
    %14 = arith.addf %12, %13 : vector<64x128xf32>
    %cst_11 = arith.constant 2.000000e-01 : f32
    %15 = vector.broadcast %cst_11 : f32 to vector<64x128xf32>
    %16 = arith.mulf %15, %14 : vector<64x128xf32>
    %17 = arith.maximumf %14, %16 : vector<64x128xf32>
    %c0_12 = arith.constant 0 : index
    %c0_13 = arith.constant 0 : index
    %18 = vector.load %arg4[%c0_12, %c0_13] : memref<128x128xf32, #tpu.memory_space<vmem>>, vector<128x128xf32>
    %cst_14 = arith.constant dense<0.000000e+00> : vector<64x128xf32>
    %19 = tpu.matmul %17, %18, %cst_14 {dimension_numbers = #tpu.dot_dimension_numbers<[1], [0], [0], [1], [0, 0, 1, 1], [], []>} : vector<64x128xf32>, vector<128x128xf32>, vector<64x128xf32> -> vector<64x128xf32>
    %20 = vector.broadcast %2 : vector<1x128xf32> to vector<64x128xf32>
    %21 = arith.addf %19, %20 : vector<64x128xf32>
    %c0_15 = arith.constant 0 : index
    %c0_16 = arith.constant 0 : index
    %22 = vector.load %arg6[%c0_15, %c0_16] : memref<64x128xf32, #tpu.memory_space<vmem>>, vector<64x128xf32>
    tpu.vector_store %arg6[%c0_15, %c0_16], %21 {strides = array<i32>} : memref<64x128xf32, #tpu.memory_space<vmem>>, vector<64x128xf32>,
    return
  }
  func.func @transform_0(%arg0: i32) -> (i32, i32) {
    %c0_i32 = arith.constant 0 : i32
    %c0_i32_0 = arith.constant 0 : i32
    return %arg0, %c0_i32 : i32, i32
  }
  func.func @transform_1(%arg0: i32) -> (i32, i32) {
    %c0_i32 = arith.constant 0 : i32
    %c0_i32_0 = arith.constant 0 : i32
    %c0_i32_1 = arith.constant 0 : i32
    return %c0_i32, %c0_i32_0 : i32, i32
  }
  func.func @transform_2(%arg0: i32) -> (i32, i32) {
    %c0_i32 = arith.constant 0 : i32
    %c0_i32_0 = arith.constant 0 : i32
    %c0_i32_1 = arith.constant 0 : i32
    return %c0_i32, %c0_i32_0 : i32, i32
  }
  func.func @transform_3(%arg0: i32) -> (i32, i32) {
    %c0_i32 = arith.constant 0 : i32
    %c0_i32_0 = arith.constant 0 : i32
    %c0_i32_1 = arith.constant 0 : i32
    return %c0_i32, %c0_i32_0 : i32, i32
  }
  func.func @transform_4(%arg0: i32) -> (i32, i32) {
    %c0_i32 = arith.constant 0 : i32
    %c0_i32_0 = arith.constant 0 : i32
    %c0_i32_1 = arith.constant 0 : i32
    return %c0_i32, %c0_i32_0 : i32, i32
  }
  func.func @transform_5(%arg0: i32) -> (i32, i32) {
    %c0_i32 = arith.constant 0 : i32
    %c0_i32_0 = arith.constant 0 : i32
    return %arg0, %c0_i32 : i32, i32
  }
}

</mosaic_0001>

<bundles_post_ra>
// kernel: encoder_forward.1
= control target key start
LH: loop header
LB: loop body
LE: loop exit
PB: predicated region body
PF: predicated region fallthrough
CT: control target
= control target key end

     0   :  { %10 = vsyncpa [#allocation3], 0  ;;  %s633_s18 = smov [#allocation2]   ;;  %s769_s0 = inlined_call_operand.vmem [shape: f32[64,32], index: 0, kind: input, shape index: {}]   ;;  %s770_s1 = inlined_call_operand.vmem [shape: bf16[32,128], index: 1, kind: input, shape index: {}]   ;;  %s771_s2 = inlined_call_operand.vmem [shape: bf16[128,128], index: 2, kind: input, shape index: {}]   ;;  %s772_s3 = inlined_call_operand.hbm [shape: bf16[128,128], index: 3, kind: input, shape index: {}]   ;;  %s773_s4 = inlined_call_operand.vmem [shape: f32[1,384], index: 4, kind: input, shape index: {}]   ;;  %s774_s5 = inlined_call_operand.vmem [shape: f32[64,128], index: 5, kind: output, shape index: {}]  }
   0x1   :  { %s22_s19 = sshll.u32 %s633_s18, 4  ;;  %s609_s22 = scalar_lea.hbm %s772_s3, 1024  ;;  %s23_s19 = int_to_ptr.vmem [resolvable:$true] %s22_s19 }
   0x2   :  { %p610_p0 = scmp.ne.s32.totalorder %s772_s3, %s609_s22  ;;  %p613_p1 = scmp.lt.u32.totalorder %s609_s22, %s772_s3 }
   0x4   :  { %p615_p2 = pnand %p613_p1, %p610_p0 }
   0x6   :  { %618 = shalt.err (!%p615_p2)
}
   0x7   :  { %s619_s27 = scalar_lea.vmem %s23_s19, 1024  ;;  %p624_p4 = scmp.lt.s32.totalorder %s23_s19, %s23_s19 }
   0x8   :  { %p620_p3 = scmp.ne.s32.totalorder %s23_s19, %s619_s27  ;;  %p625_p5 = scmp.lt.s32.totalorder %s619_s27, %s619_s27 }
   0xa   :  { %p626_p6 = por %p625_p5, %p624_p4 }
   0xc   :  { %p627_p7 = pnand %p626_p6, %p620_p3 }
   0xe   :  { %630 = shalt.err (!%p627_p7)
}
   0xf   :  { %s634_s28 = smov 64   ;;  %s635_s29 = smov 4  }
  0x10   :  { %28 = dma.hbm_to_vmem [thread:$0]  %s772_s3, 1024, %s23_s19, [#allocation3], %s634_s28, %s634_s28, %s635_s29  }
  0x11   :  { %631 = dma.done.wait [#allocation3], 1024  }
  0x12   :  { %632 = vsyncadd [#allocation3], 4294966272  ;;  %v591_v0 = vld [vmem:[%s770_s1] sm:$0xff]   ;;  %v592_v1 = vld [vmem:[%s770_s1 + $0x8] sm:$0xff]   ;;  %vm72_vm0 = vcmask 261120  }
  0x13   :  { %528 = vmatprep.subr.bf16.mxu0 %v591_v0  ;;  %v38_v2 = vld [vmem:[%s769_s0] sm:$0xff]  ;;  %v39_v3 = vld [vmem:[%s769_s0 + $0x8] sm:$0xff]  ;;  %v40_v5 = vld [vmem:[%s769_s0 + $0x10] sm:$0xff] }
  0x14   :  { %529 = vmatpush3.bf16.msra.mxu0 %v591_v0  ;;  %v46_v4 = vpack.c.bf16 %v39_v3, %v38_v2  ;;  %v41_v6 = vld [vmem:[%s769_s0 + $0x18] sm:$0xff]  ;;  %v42_v7 = vld [vmem:[%s769_s0 + $0x20] sm:$0xff]  ;;  %v43_v8 = vld [vmem:[%s769_s0 + $0x28] sm:$0xff] }
  0x15   :  { %530 = vmatprep.subr.bf16.mxu0 %v592_v1  ;;  %v593_v9 = vld [vmem:[%s771_s2] sm:$0xff]   ;;  %v47_v10 = vpack.c.bf16 %v41_v6, %v40_v5  ;;  %v594_v11 = vld [vmem:[%s771_s2 + $0x8] sm:$0xff]   ;;  %v48_v12 = vpack.c.bf16 %v43_v8, %v42_v7  ;;  %v44_v13 = vld [vmem:[%s769_s0 + $0x30] sm:$0xff] }
  0x16   :  { %532 = vmatprep.mubr.msk.bf16.mxu0 %vm72_vm0, %v46_v4  ;;  %540 = vmatprep.subr.bf16.mxu1 %v593_v9  ;;  %v45_v14 = vld [vmem:[%s769_s0 + $0x38] sm:$0xff]  ;;  %v595_v15 = vld [vmem:[%s771_s2 + $0x10] sm:$0xff]   ;;  %v597_v18 = vld [vmem:[%s771_s2 + $0x20] sm:$0xff]  }
  0x17   :  { %541 = vmatpush3.bf16.msra.mxu1 %v593_v9  ;;  %v596_v16 = vld [vmem:[%s771_s2 + $0x18] sm:$0xff]   ;;  %v49_v17 = vpack.c.bf16 %v45_v14, %v44_v13  ;;  %v598_v19 = vld [vmem:[%s771_s2 + $0x28] sm:$0xff]   ;;  %v599_v20 = vld [vmem:[%s771_s2 + $0x30] sm:$0xff]  }
  0x18   :  { %531 = vmatpush3.bf16.msra.mxu0 %v592_v1  ;;  %542 = vmatprep.subr.bf16.mxu1 %v594_v11  ;;  %v600_v21 = vld [vmem:[%s771_s2 + $0x38] sm:$0xff]   ;;  %v601_v22 = vld [vmem:[#allocation2] sm:$0xff]   ;;  %v602_v23 = vld [vmem:[#allocation2 + $0x8] sm:$0xff]  }
  0x19   :  { %564 = vmatprep.subr.bf16.mxu0 %v601_v22  ;;  %v603_v24 = vld [vmem:[#allocation2 + $0x10] sm:$0xff]   ;;  %v604_v25 = vld [vmem:[#allocation2 + $0x18] sm:$0xff]   ;;  %v605_v26 = vld [vmem:[#allocation2 + $0x20] sm:$0xff]  }
  0x1a   :  { %v473_v27 = vld [vmem:[%s773_s4] ss:$0 sm:$0xff]  ;;  %v606_v0 = vld [vmem:[#allocation2 + $0x28] sm:$0xff]   ;;  %v607_v1 = vld [vmem:[#allocation2 + $0x30] sm:$0xff]  }
  0x1b   :  { %533 = vmatmul.mubr.msk.bf16.vlgmr.msra.gmra.mrb[0].mxu0 %vm72_vm0, %v47_v10  ;;  %543 = vmatpush3.bf16.msra.mxu1 %v594_v11  ;;  %v608_v2 = vld [vmem:[#allocation2 + $0x38] sm:$0xff]   ;;  %v480_v3 = vld [vmem:[%s773_s4 + $0x1] ss:$0 sm:$0xff] }
  0x1c   :  { %536 = vmatprep.mubr.msk.bf16.mxu0 %vm72_vm0, %v48_v12  ;;  %544 = vmatprep.subr.bf16.mxu1 %v595_v15 }
  0x1d   :  { %565 = vmatpush3.bf16.msra.mxu0 %v601_v22 }
  0x1e   :  { %566 = vmatprep.subr.bf16.mxu0 %v602_v23 }
  0x1f   :  { %545 = vmatpush3.bf16.msra.mxu1 %v595_v15 }
  0x20   :  { %546 = vmatprep.subr.bf16.mxu1 %v596_v16 }
  0x21   :  { %567 = vmatpush3.bf16.msra.mxu0 %v602_v23 }
  0x22   :  { %568 = vmatprep.subr.bf16.mxu0 %v603_v24 }
  0x23   :  { %537 = vmatmul.mubr.msk.bf16.gmra.mrb[4].mxu0 %vm72_vm0, %v49_v17  ;;  %547 = vmatpush3.bf16.msra.mxu1 %v596_v16 }
  0x24   :  { %548 = vmatprep.subr.bf16.mxu1 %v597_v18 }
  0x25   :  { %569 = vmatpush3.bf16.msra.mxu0 %v603_v24 }
  0x26   :  { %570 = vmatprep.subr.bf16.mxu0 %v604_v25 }
  0x27   :  { %549 = vmatpush3.bf16.msra.mxu1 %v597_v18 }
  0x28   :  { %550 = vmatprep.subr.bf16.mxu1 %v598_v19 }
  0x29   :  { %571 = vmatpush3.bf16.msra.mxu0 %v604_v25 }
  0x2a   :  { %572 = vmatprep.subr.bf16.mxu0 %v605_v26 }
  0x2b   :  { %551 = vmatpush3.bf16.msra.mxu1 %v598_v19 }
  0x2c   :  { %552 = vmatprep.subr.bf16.mxu1 %v599_v20 }
  0x2d   :  { %573 = vmatpush3.bf16.msra.mxu0 %v605_v26 }
  0x2e   :  { %574 = vmatprep.subr.bf16.mxu0 %v606_v0 }
  0x2f   :  { %553 = vmatpush3.bf16.msra.mxu1 %v599_v20 }
  0x30   :  { %554 = vmatprep.subr.bf16.mxu1 %v600_v21 }
  0x31   :  { %575 = vmatpush3.bf16.msra.mxu0 %v606_v0 }
  0x32   :  { %576 = vmatprep.subr.bf16.mxu0 %v607_v1 }
  0x33   :  { %555 = vmatpush3.bf16.msra.mxu1 %v600_v21 }
  0x35   :  { %577 = vmatpush3.bf16.msra.mxu0 %v607_v1 }
  0x36   :  { %578 = vmatprep.subr.bf16.mxu0 %v608_v2 }
  0x39   :  { %579 = vmatpush3.bf16.msra.mxu0 %v608_v2 }
  0xee   :  { %v534_v28 = vpop.f32.mrb[0].mxu0 }
  0xef   :  { %v128_v29 = vadd.f32 %v534_v28, %v473_v27  ;;  %v119_v30 = vpop.f32.mrb[1].mxu0 }
  0xf0   :  { %v120_v31 = vadd.f32 %v473_v27, %v119_v30  ;;  %v535_v32 = vpop.f32.mrb[2].mxu0 }
  0xf1   :  { %v152_v33 = vmul.f32 0.2, %v128_v29  ;;  %v131_v34 = vadd.f32 %v535_v32, %v473_v27  ;;  %v122_v35 = vpop.f32.mrb[3].mxu0 }
  0xf2   :  { %v150_v36 = vmul.f32 0.2, %v120_v31  ;;  %v123_v37 = vadd.f32 %v473_v27, %v122_v35 }
  0xf3   :  { %v153_v38 = vmul.f32 0.2, %v131_v34  ;;  %v160_v40 = vmax.f32 %v128_v29, %v152_v33 }
  0xf4   :  { %v151_v39 = vmul.f32 0.2, %v123_v37  ;;  %v158_v43 = vmax.f32 %v120_v31, %v150_v36 }
  0xf5   :  { %v161_v41 = vmax.f32 %v131_v34, %v153_v38 }
  0xf6   :  { %v538_v42 = vpop.f32.mrb[4].mxu0  ;;  %v159_v44 = vmax.f32 %v123_v37, %v151_v39 }
  0xf7   :  { %v144_v45 = vadd.f32 %v538_v42, %v473_v27  ;;  %v135_v46 = vpop.f32.mrb[5].mxu0  ;;  %v167_v47 = vpack.c.bf16 %v161_v41, %v160_v40  ;;  %v489_v40 = vld [vmem:[%s773_s4 + $0x2] ss:$0 sm:$0xff] }
  0xf8   :  { %v136_v48 = vadd.f32 %v473_v27, %v135_v46  ;;  %v539_v49 = vpop.f32.mrb[6].mxu0  ;;  %v166_v50 = vpack.c.bf16 %v159_v44, %v158_v43 }
  0xf9   :  { %v156_v51 = vmul.f32 0.2, %v144_v45  ;;  %v147_v52 = vadd.f32 %v539_v49, %v473_v27  ;;  %v138_v53 = vpop.f32.mrb[7].mxu0 }
  0xfa   :  { %v154_v54 = vmul.f32 0.2, %v136_v48  ;;  %v139_v55 = vadd.f32 %v473_v27, %v138_v53  ;;  %556 = vmatprep.mubr.bf16.mxu1 %v166_v50 }
  0xfb   :  { %v157_v56 = vmul.f32 0.2, %v147_v52  ;;  %557 = vmatmul.mubr.bf16.vlgmr.msra.gmra.mrb[0].mxu1 %v167_v47  ;;  %v164_v58 = vmax.f32 %v144_v45, %v156_v51 }
  0xfc   :  { %v155_v57 = vmul.f32 0.2, %v139_v55  ;;  %v162_v60 = vmax.f32 %v136_v48, %v154_v54 }
  0xfd   :  { %v165_v59 = vmax.f32 %v147_v52, %v157_v56 }
  0xfe   :  { %v163_v61 = vmax.f32 %v139_v55, %v155_v57 }
  0xff   :  { %v169_v62 = vpack.c.bf16 %v165_v59, %v164_v58 }
 0x100   :  { %v168_v63 = vpack.c.bf16 %v163_v61, %v162_v60 }
 0x102   :  { %560 = vmatprep.mubr.bf16.mxu1 %v168_v63 }
 0x103   :  { %561 = vmatmul.mubr.bf16.gmra.mrb[4].mxu1 %v169_v62 }
 0x1ce   :  { %v558_v4 = vpop.f32.mrb[0].mxu1 }
 0x1cf   :  { %v283_v5 = vadd.f32 %v558_v4, %v480_v3  ;;  %v274_v6 = vpop.f32.mrb[1].mxu1 }
 0x1d0   :  { %v275_v7 = vadd.f32 %v480_v3, %v274_v6  ;;  %v559_v8 = vpop.f32.mrb[2].mxu1 }
 0x1d1   :  { %v307_v9 = vmul.f32 0.2, %v283_v5  ;;  %v286_v10 = vadd.f32 %v559_v8, %v480_v3  ;;  %v277_v11 = vpop.f32.mrb[3].mxu1 }
 0x1d2   :  { %v305_v12 = vmul.f32 0.2, %v275_v7  ;;  %v278_v13 = vadd.f32 %v480_v3, %v277_v11 }
 0x1d3   :  { %v308_v14 = vmul.f32 0.2, %v286_v10  ;;  %v315_v16 = vmax.f32 %v283_v5, %v307_v9 }
 0x1d4   :  { %v306_v15 = vmul.f32 0.2, %v278_v13  ;;  %v313_v18 = vmax.f32 %v275_v7, %v305_v12 }
 0x1d5   :  { %v316_v17 = vmax.f32 %v286_v10, %v308_v14 }
 0x1d6   :  { %v314_v19 = vmax.f32 %v278_v13, %v306_v15  ;;  %v562_v20 = vpop.f32.mrb[4].mxu1 }
 0x1d7   :  { %v322_v21 = vpack.c.bf16 %v316_v17, %v315_v16  ;;  %v299_v22 = vadd.f32 %v562_v20, %v480_v3  ;;  %v290_v23 = vpop.f32.mrb[5].mxu1 }
 0x1d8   :  { %v291_v24 = vadd.f32 %v480_v3, %v290_v23  ;;  %v563_v25 = vpop.f32.mrb[6].mxu1  ;;  %v321_v26 = vpack.c.bf16 %v314_v19, %v313_v18 }
 0x1d9   :  { %v311_v27 = vmul.f32 0.2, %v299_v22  ;;  %v302_v28 = vadd.f32 %v563_v25, %v480_v3  ;;  %v293_v29 = vpop.f32.mrb[7].mxu1 }
 0x1da   :  { %v309_v30 = vmul.f32 0.2, %v291_v24  ;;  %v294_v31 = vadd.f32 %v480_v3, %v293_v29  ;;  %580 = vmatprep.mubr.bf16.mxu0 %v321_v26 }
 0x1db   :  { %v312_v32 = vmul.f32 0.2, %v302_v28  ;;  %581 = vmatmul.mubr.bf16.vlgmr.msra.gmra.mrb[8].mxu0 %v322_v21  ;;  %v319_v34 = vmax.f32 %v299_v22, %v311_v27 }
 0x1dc   :  { %v310_v33 = vmul.f32 0.2, %v294_v31  ;;  %v317_v36 = vmax.f32 %v291_v24, %v309_v30 }
 0x1dd   :  { %v320_v35 = vmax.f32 %v302_v28, %v312_v32 }
 0x1de   :  { %v318_v37 = vmax.f32 %v294_v31, %v310_v33 }
 0x1df   :  { %v324_v38 = vpack.c.bf16 %v320_v35, %v319_v34 }
 0x1e0   :  { %v323_v39 = vpack.c.bf16 %v318_v37, %v317_v36 }
 0x1e2   :  { %584 = vmatprep.mubr.bf16.mxu0 %v323_v39 }
 0x1e3   :  { %585 = vmatmul.mubr.bf16.gmra.mrb[12].mxu0 %v324_v38 }
 0x2ae   :  { %v582_v41 = vpop.f32.mrb[8].mxu0 }
 0x2af   :  { %v438_v42 = vadd.f32 %v582_v41, %v489_v40  ;;  %v429_v43 = vpop.f32.mrb[9].mxu0 }
 0x2b0   :  { %v430_v44 = vadd.f32 %v489_v40, %v429_v43  ;;  %v583_v45 = vpop.f32.mrb[10].mxu0 }
 0x2b1   :  { %462 = vst [vmem:[%s774_s5 + $0x10] sm:$0xff] %v438_v42  ;;  %v441_v46 = vadd.f32 %v583_v45, %v489_v40  ;;  %v432_v47 = vpop.f32.mrb[11].mxu0 }
 0x2b2   :  { %460 = vst [vmem:[%s774_s5] sm:$0xff] %v430_v44  ;;  %v433_v48 = vadd.f32 %v489_v40, %v432_v47 }
 0x2b3   :  { %463 = vst [vmem:[%s774_s5 + $0x18] sm:$0xff] %v441_v46 }
 0x2b4   :  { %461 = vst [vmem:[%s774_s5 + $0x8] sm:$0xff] %v433_v48 }
 0x2b6   :  { %v586_v49 = vpop.f32.mrb[12].mxu0 }
 0x2b7   :  { %v454_v50 = vadd.f32 %v586_v49, %v489_v40  ;;  %v445_v51 = vpop.f32.mrb[13].mxu0 }
 0x2b8   :  { %v446_v52 = vadd.f32 %v489_v40, %v445_v51  ;;  %v587_v53 = vpop.f32.mrb[14].mxu0 }
 0x2b9   :  { %466 = vst [vmem:[%s774_s5 + $0x30] sm:$0xff] %v454_v50  ;;  %v457_v54 = vadd.f32 %v587_v53, %v489_v40  ;;  %v448_v55 = vpop.f32.mrb[15].mxu0 }
 0x2ba   :  { %464 = vst [vmem:[%s774_s5 + $0x20] sm:$0xff] %v446_v52  ;;  %v449_v56 = vadd.f32 %v489_v40, %v448_v55 }
 0x2bb   :  { %467 = vst [vmem:[%s774_s5 + $0x38] sm:$0xff] %v457_v54 }
 0x2bc   :  { %465 = vst [vmem:[%s774_s5 + $0x28] sm:$0xff] %v449_v56 }
 0x2bd   :  { %472 = vsyncpa [#allocation3], 1 }

// kernel: encoder_forward.1
= control target key start
LH: loop header
LB: loop body
LE: loop exit
PB: predicated region body
PF: predicated region fallthrough
CT: control target
= control target key end

     0   :  { %10 = vsyncpa [#allocation3], 0  ;;  %s937_s0 = inlined_call_operand.vmem [shape: f32[64,32], index: 0, kind: input, shape index: {}]   ;;  %s938_s1 = inlined_call_operand.vmem [shape: f32[32,128], index: 1, kind: input, shape index: {}]   ;;  %s939_s2 = inlined_call_operand.hbm [shape: f32[128,128], index: 2, kind: input, shape index: {}]   ;;  %s940_s3 = inlined_call_operand.hbm [shape: f32[128,128], index: 3, kind: input, shape index: {}]   ;;  %s941_s4 = inlined_call_operand.vmem [shape: f32[1,384], index: 4, kind: input, shape index: {}]   ;;  %s942_s5 = inlined_call_operand.vmem [shape: f32[64,128], index: 5, kind: output, shape index: {}]  }
   0x1   :  { %11 = vsyncpa [#allocation5], 0  ;;  %s802_s18 = smov [#allocation2]   ;;  %s754_s22 = scalar_lea.hbm %s939_s2, 2048 }
   0x2   :  { %s21_s19 = sshll.u32 %s802_s18, 4  ;;  %p755_p0 = scmp.ne.s32.totalorder %s939_s2, %s754_s22  ;;  %s22_s19 = int_to_ptr.vmem [resolvable:$true] %s21_s19 }
   0x3   :  { %p758_p1 = scmp.lt.u32.totalorder %s754_s22, %s939_s2 }
   0x5   :  { %p760_p2 = pnand %p758_p1, %p755_p0 }
   0x7   :  { %763 = shalt.err (!%p760_p2)
}
   0x8   :  { %s764_s27 = scalar_lea.vmem %s22_s19, 2048  ;;  %p769_p4 = scmp.lt.s32.totalorder %s22_s19, %s22_s19 }
   0x9   :  { %p765_p3 = scmp.ne.s32.totalorder %s22_s19, %s764_s27  ;;  %p770_p5 = scmp.lt.s32.totalorder %s764_s27, %s764_s27 }
   0xb   :  { %p771_p6 = por %p770_p5, %p769_p4 }
   0xd   :  { %p772_p7 = pnand %p771_p6, %p765_p3 }
   0xf   :  { %775 = shalt.err (!%p772_p7)
}
  0x10   :  { %s803_s28 = smov 128   ;;  %s804_s29 = smov 8  }
  0x11   :  { %27 = dma.hbm_to_vmem [thread:$0]  %s939_s2, 2048, %s22_s19, [#allocation3], %s803_s28, %s803_s28, %s804_s29  }
  0x12   :  { %s805_s7 = smov [#allocation4]   ;;  %s776_s11 = scalar_lea.hbm %s940_s3, 2048 }
  0x13   :  { %s33_s8 = sshll.u32 %s805_s7, 4  ;;  %p777_p8 = scmp.ne.s32.totalorder %s940_s3, %s776_s11  ;;  %s34_s8 = int_to_ptr.vmem [resolvable:$true] %s33_s8 }
  0x14   :  { %p780_p9 = scmp.lt.u32.totalorder %s776_s11, %s940_s3 }
  0x16   :  { %p782_p10 = pnand %p780_p9, %p777_p8 }
  0x18   :  { %785 = shalt.err (!%p782_p10)
}
  0x19   :  { %s786_s16 = scalar_lea.vmem %s34_s8, 2048  ;;  %p791_p12 = scmp.lt.s32.totalorder %s34_s8, %s34_s8 }
  0x1a   :  { %p787_p11 = scmp.ne.s32.totalorder %s34_s8, %s786_s16  ;;  %p792_p13 = scmp.lt.s32.totalorder %s786_s16, %s786_s16 }
  0x1c   :  { %p793_p0 = por %p792_p13, %p791_p12 }
  0x1e   :  { %p794_p1 = pnand %p793_p0, %p787_p11 }
  0x20   :  { %797 = shalt.err (!%p794_p1)
}
  0x21   :  { %39 = dma.hbm_to_vmem [thread:$0]  %s940_s3, 2048, %s34_s8, [#allocation5], %s803_s28, %s803_s28, %s804_s29  }
  0x22   :  { %798 = dma.done.wait [#allocation3], 2048  }
  0x23   :  { %799 = vsyncadd [#allocation3], 4294965248 }
  0x24   :  { %800 = dma.done.wait [#allocation5], 2048  }
  0x25   :  { %801 = vsyncadd [#allocation5], 4294965248  ;;  %vm69_vm0 = vcmask 261120   ;;  %v59_v0 = vld [vmem:[%s938_s1] sm:$0xff]  ;;  %v60_v1 = vld [vmem:[%s938_s1 + $0x8] sm:$0xff] }
  0x26   :  { %v61_v2 = vld [vmem:[%s938_s1 + $0x10] sm:$0xff]  ;;  %v678_v3 = vpack.c.bf16 %v60_v1, %v59_v0  ;;  %v62_v4 = vld [vmem:[%s938_s1 + $0x18] sm:$0xff]  ;;  %v51_v5 = vld [vmem:[%s937_s0] sm:$0xff] }
  0x27   :  { %v682_v6 = vpack.c.bf16 %v62_v4, %v61_v2  ;;  %578 = vmatprep.mubr.msk.f32.mxu0 %vm69_vm0, %v51_v5  ;;  %v215_v7 = vld [vmem:[#allocation2] sm:$0xff]  ;;  %v216_v8 = vld [vmem:[#allocation2 + $0x8] sm:$0xff]  ;;  %v217_v9 = vld [vmem:[#allocation2 + $0x10] sm:$0xff] }
  0x28   :  { %679 = vmatprep.subr.bf16.mxu0 %v678_v3  ;;  %v686_v10 = vpack.c.bf16 %v216_v8, %v215_v7  ;;  %v218_v11 = vld [vmem:[#allocation2 + $0x18] sm:$0xff]  ;;  %v219_v13 = vld [vmem:[#allocation2 + $0x20] sm:$0xff]  ;;  %v220_v14 = vld [vmem:[#allocation2 + $0x28] sm:$0xff] }
  0x29   :  { %681 = vmatpush3.bf16.msra.mxu0 %v678_v3  ;;  %v690_v12 = vpack.c.bf16 %v218_v11, %v217_v9  ;;  %v52_v15 = vld [vmem:[%s937_s0 + $0x8] sm:$0xff]  ;;  %v53_v16 = vld [vmem:[%s937_s0 + $0x10] sm:$0xff]  ;;  %v694_v17 = vpack.c.bf16 %v220_v14, %v219_v13  ;;  %v222_v19 = vld [vmem:[#allocation2 + $0x38] sm:$0xff] }
  0x2a   :  { %683 = vmatprep.subr.bf16.mxu0 %v682_v6  ;;  %687 = vmatprep.subr.bf16.mxu1 %v686_v10  ;;  %v221_v18 = vld [vmem:[#allocation2 + $0x30] sm:$0xff]  ;;  %v54_v20 = vld [vmem:[%s937_s0 + $0x18] sm:$0xff]  ;;  %v55_v21 = vld [vmem:[%s937_s0 + $0x20] sm:$0xff] }
  0x2b   :  { %689 = vmatpush3.bf16.msra.mxu1 %v686_v10  ;;  %v698_v22 = vpack.c.bf16 %v222_v19, %v221_v18  ;;  %v223_v23 = vld [vmem:[#allocation2 + $0x40] sm:$0xff]  ;;  %v224_v24 = vld [vmem:[#allocation2 + $0x48] sm:$0xff]  ;;  %v57_v26 = vld [vmem:[%s937_s0 + $0x30] sm:$0xff] }
  0x2c   :  { %691 = vmatprep.subr.bf16.mxu1 %v690_v12  ;;  %v56_v25 = vld [vmem:[%s937_s0 + $0x28] sm:$0xff]  ;;  %v702_v27 = vpack.c.bf16 %v224_v24, %v223_v23  ;;  %v225_v28 = vld [vmem:[#allocation2 + $0x50] sm:$0xff]  ;;  %v226_v29 = vld [vmem:[#allocation2 + $0x58] sm:$0xff] }
  0x2d   :  { %685 = vmatpush3.bf16.msra.mxu0 %v682_v6  ;;  %v58_v30 = vld [vmem:[%s937_s0 + $0x38] sm:$0xff]  ;;  %v706_v31 = vpack.c.bf16 %v226_v29, %v225_v28  ;;  %v227_v32 = vld [vmem:[#allocation2 + $0x60] sm:$0xff]  ;;  %v228_v33 = vld [vmem:[#allocation2 + $0x68] sm:$0xff] }
  0x2e   :  { %v710_v34 = vpack.c.bf16 %v228_v33, %v227_v32  ;;  %v229_v35 = vld [vmem:[#allocation2 + $0x70] sm:$0xff]  ;;  %v230_v36 = vld [vmem:[#allocation2 + $0x78] sm:$0xff]  ;;  %v358_v38 = vld [vmem:[#allocation4] sm:$0xff] }
  0x2f   :  { %693 = vmatpush3.bf16.msra.mxu1 %v690_v12  ;;  %v714_v37 = vpack.c.bf16 %v230_v36, %v229_v35  ;;  %v359_v39 = vld [vmem:[#allocation4 + $0x8] sm:$0xff]  ;;  %v360_v40 = vld [vmem:[#allocation4 + $0x10] sm:$0xff]  ;;  %v361_v42 = vld [vmem:[#allocation4 + $0x18] sm:$0xff] }
  0x30   :  { %579 = vmatmul.mubr.msk.f32.vlgmr.msra.gmra.mrb[0].mxu0 %vm69_vm0, %v52_v15  ;;  %695 = vmatprep.subr.bf16.mxu1 %v694_v17  ;;  %v718_v41 = vpack.c.bf16 %v359_v39, %v358_v38  ;;  %v722_v43 = vpack.c.bf16 %v361_v42, %v360_v40  ;;  %v362_v44 = vld [vmem:[#allocation4 + $0x20] sm:$0xff]  ;;  %v363_v45 = vld [vmem:[#allocation4 + $0x28] sm:$0xff]  ;;  %v364_v47 = vld [vmem:[#allocation4 + $0x30] sm:$0xff] }
  0x31   :  { %581 = vmatprep.mubr.msk.f32.mxu0 %vm69_vm0, %v53_v16  ;;  %v726_v46 = vpack.c.bf16 %v363_v45, %v362_v44  ;;  %v365_v48 = vld [vmem:[#allocation4 + $0x38] sm:$0xff]  ;;  %v366_v50 = vld [vmem:[#allocation4 + $0x40] sm:$0xff]  ;;  %v367_v51 = vld [vmem:[#allocation4 + $0x48] sm:$0xff] }
  0x32   :  { %719 = vmatprep.subr.bf16.mxu0 %v718_v41  ;;  %v730_v49 = vpack.c.bf16 %v365_v48, %v364_v47  ;;  %v734_v52 = vpack.c.bf16 %v367_v51, %v366_v50  ;;  %v368_v53 = vld [vmem:[#allocation4 + $0x50] sm:$0xff]  ;;  %v369_v54 = vld [vmem:[#allocation4 + $0x58] sm:$0xff]  ;;  %v499_v56 = vld [vmem:[%s941_s4] ss:$0 sm:$0xff] }
  0x33   :  { %697 = vmatpush3.bf16.msra.mxu1 %v694_v17  ;;  %721 = vmatpush3.bf16.msra.mxu0 %v718_v41  ;;  %v738_v55 = vpack.c.bf16 %v369_v54, %v368_v53  ;;  %v372_v28 = vld [vmem:[#allocation4 + $0x70] sm:$0xff]  ;;  %v373_v29 = vld [vmem:[#allocation4 + $0x78] sm:$0xff] }
  0x34   :  { %582 = vmatmul.mubr.msk.f32.gmra.mrb[2].mxu0 %vm69_vm0, %v54_v20  ;;  %699 = vmatprep.subr.bf16.mxu1 %v698_v22 }
  0x35   :  { %584 = vmatprep.mubr.msk.f32.mxu0 %vm69_vm0, %v55_v21  ;;  %723 = vmatprep.subr.bf16.mxu0 %v722_v43 }
  0x37   :  { %701 = vmatpush3.bf16.msra.mxu1 %v698_v22  ;;  %725 = vmatpush3.bf16.msra.mxu0 %v722_v43 }
  0x38   :  { %585 = vmatmul.mubr.msk.f32.gmra.mrb[4].mxu0 %vm69_vm0, %v56_v25  ;;  %703 = vmatprep.subr.bf16.mxu1 %v702_v27  ;;  %v370_v25 = vld [vmem:[#allocation4 + $0x60] sm:$0xff] }
  0x39   :  { %587 = vmatprep.mubr.msk.f32.mxu0 %vm69_vm0, %v57_v26  ;;  %727 = vmatprep.subr.bf16.mxu0 %v726_v46  ;;  %v371_v26 = vld [vmem:[#allocation4 + $0x68] sm:$0xff] }
  0x3b   :  { %705 = vmatpush3.bf16.msra.mxu1 %v702_v27  ;;  %729 = vmatpush3.bf16.msra.mxu0 %v726_v46  ;;  %v742_v27 = vpack.c.bf16 %v371_v26, %v370_v25 }
  0x3c   :  { %588 = vmatmul.mubr.msk.f32.gmra.mrb[6].mxu0 %vm69_vm0, %v58_v30  ;;  %707 = vmatprep.subr.bf16.mxu1 %v706_v31  ;;  %v746_v30 = vpack.c.bf16 %v373_v29, %v372_v28 }
  0x3d   :  { %731 = vmatprep.subr.bf16.mxu0 %v730_v49 }
  0x3f   :  { %709 = vmatpush3.bf16.msra.mxu1 %v706_v31  ;;  %733 = vmatpush3.bf16.msra.mxu0 %v730_v49  ;;  %v508_v31 = vld [vmem:[%s941_s4 + $0x1] ss:$0 sm:$0xff] }
  0x40   :  { %711 = vmatprep.subr.bf16.mxu1 %v710_v34  ;;  %735 = vmatprep.subr.bf16.mxu0 %v734_v52 }
  0x43   :  { %713 = vmatpush3.bf16.msra.mxu1 %v710_v34  ;;  %737 = vmatpush3.bf16.msra.mxu0 %v734_v52 }
  0x44   :  { %715 = vmatprep.subr.bf16.mxu1 %v714_v37  ;;  %739 = vmatprep.subr.bf16.mxu0 %v738_v55 }
  0x47   :  { %717 = vmatpush3.bf16.msra.mxu1 %v714_v37  ;;  %741 = vmatpush3.bf16.msra.mxu0 %v738_v55 }
  0x48   :  { %743 = vmatprep.subr.bf16.mxu0 %v742_v27 }
  0x4b   :  { %745 = vmatpush3.bf16.msra.mxu0 %v742_v27 }
  0x4c   :  { %747 = vmatprep.subr.bf16.mxu0 %v746_v30 }
  0x4f   :  { %749 = vmatpush3.bf16.msra.mxu0 %v746_v30 }
 0x103   :  { %v580_v57 = vpop.f32.mrb[0].mxu0 }
 0x104   :  { %v166_v58 = vadd.f32 %v580_v57, %v499_v56  ;;  %v160_v59 = vpop.f32.mrb[1].mxu0 }
 0x105   :  { %v161_v60 = vadd.f32 %v499_v56, %v160_v59 }
 0x106   :  { %v200_v61 = vmul.f32 0.2, %v166_v58 }
 0x107   :  { %v583_v62 = vpop.f32.mrb[2].mxu0  ;;  %v199_v63 = vmul.f32 0.2, %v161_v60 }
 0x108   :  { %v176_v0 = vadd.f32 %v583_v62, %v499_v56  ;;  %v170_v1 = vpop.f32.mrb[3].mxu0  ;;  %v208_v4 = vmax.f32 %v166_v58, %v200_v61 }
 0x109   :  { %v171_v2 = vadd.f32 %v499_v56, %v170_v1  ;;  %v207_v3 = vmax.f32 %v161_v60, %v199_v63 }
 0x10a   :  { %v202_v5 = vmul.f32 0.2, %v176_v0 }
 0x10b   :  { %v201_v6 = vmul.f32 0.2, %v171_v2  ;;  %v586_v7 = vpop.f32.mrb[4].mxu0  ;;  %622 = vmatprep.mubr.f32.mxu1 %v207_v3 }
 0x10c   :  { %v186_v8 = vadd.f32 %v586_v7, %v499_v56  ;;  %v180_v9 = vpop.f32.mrb[5].mxu0  ;;  %623 = vmatmul.mubr.f32.vlgmr.msra.gmra.mrb[0].mxu1 %v208_v4  ;;  %v210_v12 = vmax.f32 %v176_v0, %v202_v5  ;;  %v509_v0 = vld [vmem:[%s941_s4 + $0x2] ss:$0 sm:$0xff] }
 0x10d   :  { %v209_v10 = vmax.f32 %v171_v2, %v201_v6  ;;  %v181_v11 = vadd.f32 %v499_v56, %v180_v9 }
 0x10e   :  { %v204_v13 = vmul.f32 0.2, %v186_v8 }
 0x10f   :  { %v203_v14 = vmul.f32 0.2, %v181_v11  ;;  %v589_v15 = vpop.f32.mrb[6].mxu0  ;;  %625 = vmatprep.mubr.f32.mxu1 %v209_v10 }
 0x110   :  { %v196_v16 = vadd.f32 %v589_v15, %v499_v56  ;;  %v190_v17 = vpop.f32.mrb[7].mxu0  ;;  %626 = vmatmul.mubr.f32.gmra.mrb[2].mxu1 %v210_v12  ;;  %v212_v20 = vmax.f32 %v186_v8, %v204_v13 }
 0x111   :  { %v211_v18 = vmax.f32 %v181_v11, %v203_v14  ;;  %v191_v19 = vadd.f32 %v499_v56, %v190_v17 }
 0x112   :  { %v206_v21 = vmul.f32 0.2, %v196_v16 }
 0x113   :  { %v205_v22 = vmul.f32 0.2, %v191_v19  ;;  %628 = vmatprep.mubr.f32.mxu1 %v211_v18 }
 0x114   :  { %629 = vmatmul.mubr.f32.gmra.mrb[4].mxu1 %v212_v20  ;;  %v214_v24 = vmax.f32 %v196_v16, %v206_v21 }
 0x115   :  { %v213_v23 = vmax.f32 %v191_v19, %v205_v22 }
 0x117   :  { %631 = vmatprep.mubr.f32.mxu1 %v213_v23 }
 0x118   :  { %632 = vmatmul.mubr.f32.gmra.mrb[6].mxu1 %v214_v24 }
 0x1df   :  { %v624_v32 = vpop.f32.mrb[0].mxu1 }
 0x1e0   :  { %v309_v33 = vadd.f32 %v624_v32, %v508_v31  ;;  %v303_v34 = vpop.f32.mrb[1].mxu1 }
 0x1e1   :  { %v304_v35 = vadd.f32 %v508_v31, %v303_v34 }
 0x1e2   :  { %v343_v36 = vmul.f32 0.2, %v309_v33 }
 0x1e3   :  { %v342_v37 = vmul.f32 0.2, %v304_v35  ;;  %v627_v38 = vpop.f32.mrb[2].mxu1 }
 0x1e4   :  { %v319_v39 = vadd.f32 %v627_v38, %v508_v31  ;;  %v313_v40 = vpop.f32.mrb[3].mxu1  ;;  %v351_v43 = vmax.f32 %v309_v33, %v343_v36 }
 0x1e5   :  { %v350_v41 = vmax.f32 %v304_v35, %v342_v37  ;;  %v314_v42 = vadd.f32 %v508_v31, %v313_v40 }
 0x1e6   :  { %v345_v44 = vmul.f32 0.2, %v319_v39 }
 0x1e7   :  { %v344_v45 = vmul.f32 0.2, %v314_v42  ;;  %v630_v46 = vpop.f32.mrb[4].mxu1  ;;  %666 = vmatprep.mubr.f32.mxu0 %v350_v41 }
 0x1e8   :  { %v329_v47 = vadd.f32 %v630_v46, %v508_v31  ;;  %v323_v48 = vpop.f32.mrb[5].mxu1  ;;  %667 = vmatmul.mubr.f32.vlgmr.msra.gmra.mrb[8].mxu0 %v351_v43  ;;  %v353_v51 = vmax.f32 %v319_v39, %v345_v44 }
 0x1e9   :  { %v352_v49 = vmax.f32 %v314_v42, %v344_v45  ;;  %v324_v50 = vadd.f32 %v508_v31, %v323_v48 }
 0x1ea   :  { %v347_v52 = vmul.f32 0.2, %v329_v47 }
 0x1eb   :  { %v346_v53 = vmul.f32 0.2, %v324_v50  ;;  %v633_v54 = vpop.f32.mrb[6].mxu1  ;;  %669 = vmatprep.mubr.f32.mxu0 %v352_v49 }
 0x1ec   :  { %v339_v55 = vadd.f32 %v633_v54, %v508_v31  ;;  %v333_v56 = vpop.f32.mrb[7].mxu1  ;;  %670 = vmatmul.mubr.f32.gmra.mrb[10].mxu0 %v353_v51  ;;  %v355_v59 = vmax.f32 %v329_v47, %v347_v52 }
 0x1ed   :  { %v354_v57 = vmax.f32 %v324_v50, %v346_v53  ;;  %v334_v58 = vadd.f32 %v508_v31, %v333_v56 }
 0x1ee   :  { %v349_v60 = vmul.f32 0.2, %v339_v55 }
 0x1ef   :  { %v348_v61 = vmul.f32 0.2, %v334_v58  ;;  %672 = vmatprep.mubr.f32.mxu0 %v354_v57 }
 0x1f0   :  { %673 = vmatmul.mubr.f32.gmra.mrb[12].mxu0 %v355_v59  ;;  %v357_v63 = vmax.f32 %v339_v55, %v349_v60 }
 0x1f1   :  { %v356_v62 = vmax.f32 %v334_v58, %v348_v61 }
 0x1f3   :  { %675 = vmatprep.mubr.f32.mxu0 %v356_v62 }
 0x1f4   :  { %676 = vmatmul.mubr.f32.gmra.mrb[14].mxu0 %v357_v63 }
 0x2bb   :  { %v668_v1 = vpop.f32.mrb[8].mxu0 }
 0x2bc   :  { %v452_v2 = vadd.f32 %v668_v1, %v509_v0  ;;  %v446_v3 = vpop.f32.mrb[9].mxu0 }
 0x2bd   :  { %v447_v4 = vadd.f32 %v509_v0, %v446_v3 }
 0x2be   :  { %486 = vst [vmem:[%s942_s5 + $0x8] sm:$0xff] %v452_v2 }
 0x2bf   :  { %485 = vst [vmem:[%s942_s5] sm:$0xff] %v447_v4  ;;  %v671_v5 = vpop.f32.mrb[10].mxu0 }
 0x2c0   :  { %v462_v6 = vadd.f32 %v671_v5, %v509_v0  ;;  %v456_v7 = vpop.f32.mrb[11].mxu0 }
 0x2c1   :  { %v457_v8 = vadd.f32 %v509_v0, %v456_v7 }
 0x2c2   :  { %488 = vst [vmem:[%s942_s5 + $0x18] sm:$0xff] %v462_v6 }
 0x2c3   :  { %487 = vst [vmem:[%s942_s5 + $0x10] sm:$0xff] %v457_v8  ;;  %v674_v9 = vpop.f32.mrb[12].mxu0 }
 0x2c4   :  { %v472_v10 = vadd.f32 %v674_v9, %v509_v0  ;;  %v466_v11 = vpop.f32.mrb[13].mxu0 }
 0x2c5   :  { %v467_v12 = vadd.f32 %v509_v0, %v466_v11 }
 0x2c6   :  { %490 = vst [vmem:[%s942_s5 + $0x28] sm:$0xff] %v472_v10 }
 0x2c7   :  { %489 = vst [vmem:[%s942_s5 + $0x20] sm:$0xff] %v467_v12  ;;  %v677_v13 = vpop.f32.mrb[14].mxu0 }
 0x2c8   :  { %v482_v14 = vadd.f32 %v677_v13, %v509_v0  ;;  %v476_v15 = vpop.f32.mrb[15].mxu0 }
 0x2c9   :  { %v477_v16 = vadd.f32 %v509_v0, %v476_v15 }
 0x2ca   :  { %492 = vst [vmem:[%s942_s5 + $0x38] sm:$0xff] %v482_v14 }
 0x2cb   :  { %491 = vst [vmem:[%s942_s5 + $0x30] sm:$0xff] %v477_v16 }
 0x2cc   :  { %497 = vsyncpa [#allocation3], 1 }
 0x2cd   :  { %498 = vsyncpa [#allocation5], 1 }

</bundles_post_ra>
